<compile_context>
chip_gen: v7x
topology: tpu7x:2x2x1
jax: 0.10.0
libtpu: 0.0.40
codegen_flags: <defaults>
</compile_context>

<pallas_src>
import jax
import jax.numpy as jnp
from jax.experimental import pallas as pl
from jax.experimental.pallas import tpu as pltpu

_NEG_BIG = -1e30  # finite "-inf" stand-in (keeps the online LSE NaN-free)


def _round_up(x, m):
    return (x + m - 1) // m * m


def _vmem_estimate(tile_i, tile_j, c):
    # Double-buffered pipelined inputs + output + scratch + the logits tile.
    return (2 * tile_i * c * 2        # logp_scaled (bf16), resident per i-tile
            + 2 * c * tile_j * 2      # q^T column tiles (bf16)
            + 2 * tile_j * 4          # H(q)/T row (f32)
            + 2 * tile_i * 4          # per-row LSE output (f32)
            + 2 * tile_i * 4          # m / l scratch (f32)
            + tile_i * tile_j * 4)    # logits tile (f32)


def _choose_tiles(B, C):
    if B <= 128:
        tile_j = _round_up(max(B, 1), 8)
        b_pad = tile_j
        tile_i = tile_j
    else:
        tile_j = 256                      # MXU-native width on v6e/v7x
        b_pad = _round_up(B, tile_j)
        tile_i = tile_j
        # Grow the resident i-tile (divides the number of full q^T restreams
        # from HBM) while it divides b_pad and VMEM stays comfortable even on
        # v7x (64 MiB physical).
        while (tile_i < 512 and b_pad % (tile_i * 2) == 0
               and _vmem_estimate(tile_i * 2, tile_j, C) <= 40 * (1 << 20)):
            tile_i *= 2
    # Expose >= 2 i-tiles when possible so the "parallel" axis can be sharded
    # across v7x's two TensorCores (harmless on single-TC v5e/v6e).
    if b_pad // tile_i < 2 and tile_i % 16 == 0:
        tile_i //= 2
    return tile_i, tile_j, b_pad


def _cluster_kl_lse_kernel(logp_ref, qt_ref, h_ref, out_ref, m_sc, l_sc):
    """Flash-style online logsumexp over logits = logp @ qT + h (per i-tile)."""
    j = pl.program_id(1)
    nj = pl.num_programs(1)

    @pl.when(j == 0)
    def _init():
        m_sc[...] = jnp.full_like(m_sc, _NEG_BIG)
        l_sc[...] = jnp.zeros_like(l_sc)

    # (TILE_I, TILE_J) logits tile: bf16 MXU operands, f32 accumulation.
    # 1/T is already folded into logp_ref and h_ref; padded columns arrive as
    # q^T = 0 and h = -1e30, so they vanish from the LSE with no mask here.
    logits = jnp.dot(logp_ref[...], qt_ref[...],
                     preferred_element_type=jnp.float32) + h_ref[...]

    m_prev = m_sc[...]
    m_new = jnp.maximum(m_prev, jnp.max(logits, axis=-1, keepdims=True))
    alpha = jnp.exp(m_prev - m_new)
    l_sc[...] = alpha * l_sc[...] + jnp.sum(jnp.exp(logits - m_new),
                                            axis=-1, keepdims=True)
    m_sc[...] = m_new

    @pl.when(j == nj - 1)
    def _final():
        out_ref[...] = m_sc[...] + jnp.log(l_sc[...])


def cluster_kl_loss(c_i, c_j, temperature):
    B, C = c_i.shape
    assert c_j.shape == (B, C)
    inv_t = 1.0 / float(temperature)

    # ---- O(B*C) prep, done once in XLA (hoisted out of the kernel). --------
    logp = jax.nn.log_softmax(c_i.astype(jnp.float32), axis=-1)     # (B, C)
    logq = jax.nn.log_softmax(c_j.astype(jnp.float32), axis=-1)     # (B, C)
    q = jnp.exp(logq)                                               # softmax(c_j)
    h = -jnp.sum(q * logq, axis=-1) * inv_t                         # H(q_j)/T, (B,)

    # bf16 MXU operands (f32 accumulate inside the kernel).
    logp_s = (logp * inv_t).astype(jnp.bfloat16)                    # (B, C)
    q_bf = q.astype(jnp.bfloat16)                                   # (B, C)

    # Diagonal (label) logits from the SAME bf16 operands the kernel uses, so
    # bf16 rounding cancels in (lse - diag); h stays f32.
    diag = jnp.sum(logp_s.astype(jnp.float32) * q_bf.astype(jnp.float32),
                   axis=-1) + h                                     # (B,)

    # ---- tiling / padding ---------------------------------------------------
    tile_i, tile_j, b_pad = _choose_tiles(B, C)
    if b_pad != B:
        logp_s = jnp.pad(logp_s, ((0, b_pad - B), (0, 0)))          # rows: harmless
        q_bf = jnp.pad(q_bf, ((0, b_pad - B), (0, 0)))              # cols: zeros
        h = jnp.pad(h, (0, b_pad - B), constant_values=_NEG_BIG)    # cols: masked
    q_t = q_bf.T                                                    # (C, b_pad)
    h_row = h.reshape(1, b_pad)

    n_i = b_pad // tile_i
    n_j = b_pad // tile_j
    grid = (n_i, n_j)

    cost = pl.CostEstimate(
        flops=2 * b_pad * b_pad * C + 8 * b_pad * b_pad,
        transcendentals=b_pad * b_pad + 3 * b_pad * n_j,
        bytes_accessed=(2 * b_pad * C                 # logp (bf16), once
                        + n_i * (2 * b_pad * C        # q^T re-streamed per i-tile
                                 + 4 * b_pad)         # h row per i-tile
                        + 4 * b_pad),                 # per-row LSE out
    )

    lse = pl.pallas_call(
        _cluster_kl_lse_kernel,
        out_shape=jax.ShapeDtypeStruct((b_pad, 1), jnp.float32),
        grid_spec=pltpu.PrefetchScalarGridSpec(
            num_scalar_prefetch=0,
            grid=grid,
            in_specs=[
                pl.BlockSpec((tile_i, C), lambda i, j: (i, 0)),   # logp/T rows (resident over j)
                pl.BlockSpec((C, tile_j), lambda i, j: (0, j)),   # q^T column tiles (pipelined)
                pl.BlockSpec((1, tile_j), lambda i, j: (0, j)),   # H(q)/T row tiles
            ],
            out_specs=pl.BlockSpec((tile_i, 1), lambda i, j: (i, 0)),
            scratch_shapes=[
                pltpu.VMEM((tile_i, 1), jnp.float32),   # running max
                pltpu.VMEM((tile_i, 1), jnp.float32),   # running sum-exp
            ],
        ),
        compiler_params=pltpu.CompilerParams(
            dimension_semantics=("parallel", "arbitrary"),
            vmem_limit_bytes=48 * 1024 * 1024,   # fits v7x's 64 MiB physical VMEM
        ),
        cost_estimate=cost,
    )(logp_s, q_t, h_row)

    # Padded rows are simply sliced off; final scalar reduction stays in XLA.
    return jnp.sum(lse[:B, 0] - diag) / B


def _reference(c_i, c_j, temperature):
    # Pure-JAX reference mirroring the PyTorch loop semantics (f32 throughout).
    logp = jax.nn.log_softmax(c_i, axis=-1)
    q = jax.nn.softmax(c_j, axis=-1)
    logq = jax.nn.log_softmax(c_j, axis=-1)
    kl = jnp.sum(q * logq, axis=-1)[None, :] - logp @ q.T
    logits = -kl / temperature
    B = c_i.shape[0]
    lse = jax.nn.logsumexp(logits, axis=-1)
    return jnp.sum(lse - jnp.diag(logits)) / B


if __name__ == "__main__":
    batch_size = 8       # rows fed to the loss
    num_clusters = 32    # cluster-probability dimension
    temperature = 0.5

    key = jax.random.PRNGKey(0)
    k1, k2 = jax.random.split(key)
    c_i = jax.random.normal(k1, (batch_size, num_clusters), dtype=jnp.float32)
    c_j = jax.random.normal(k2, (batch_size, num_clusters), dtype=jnp.float32)

    loss = jax.jit(cluster_kl_loss, static_argnums=2)(c_i, c_j, temperature)
    jax.block_until_ready(loss)
    ref = _reference(c_i, c_j, temperature)
    # Tolerance covers the bf16 MXU operands (accumulation is f32, and the
    # diagonal term is built from the same bf16 operands so most error cancels).
    assert jnp.allclose(loss, ref, rtol=1e-2, atol=1e-2), (loss, ref)

    # Unaligned shape exercises the batch-padding / column-masking path.
    k3, k4 = jax.random.split(k2)
    c_i2 = jax.random.normal(k3, (6, 10), dtype=jnp.float32)
    c_j2 = jax.random.normal(k4, (6, 10), dtype=jnp.float32)
    loss2 = jax.jit(cluster_kl_loss, static_argnums=2)(c_i2, c_j2, temperature)
    jax.block_until_ready(loss2)
    ref2 = _reference(c_i2, c_j2, temperature)
    assert jnp.allclose(loss2, ref2, rtol=1e-2, atol=1e-2), (loss2, ref2)

    print("KERNEL_OK")
</pallas_src>

<mosaic_0001>
module attributes {stable_mosaic.version = 11 : i64} {
  func.func @_cluster_kl_lse_kernel(%arg0: i32, %arg1: i32, %arg2: memref<8x32xbf16, #tpu.memory_space<vmem>>, %arg3: memref<32x8xbf16, #tpu.memory_space<vmem>>, %arg4: memref<1x8xf32, #tpu.memory_space<vmem>>, %arg5: memref<8x1xf32, #tpu.memory_space<vmem>>, %arg6: memref<8x1xf32, #tpu.memory_space<vmem>>, %arg7: memref<8x1xf32, #tpu.memory_space<vmem>>) attributes {dimension_semantics = [#tpu.dimension_semantics<parallel>, #tpu.dimension_semantics<arbitrary>], iteration_bounds = array<i64: 1, 1>, scalar_prefetch = 0 : i64, scratch_operands = 2 : i64, tpu.core_type = #tpu.core_type<tc>, window_params = [{transform_indices = @transform_0, window_bounds = array<i64: 8, 32>}, {transform_indices = @transform_1, window_bounds = array<i64: 32, 8>}, {transform_indices = @transform_2, window_bounds = array<i64: 1, 8>}, {transform_indices = @transform_3, window_bounds = array<i64: 8, 1>}]} {
    %c0_i32 = arith.constant 0 : i32
    %0 = arith.cmpi eq, %arg1, %c0_i32 : i32
    %1 = arith.extui %0 : i1 to i32
    %c0_i32_0 = arith.constant 0 : i32
    %2 = arith.cmpi ne, %1, %c0_i32_0 : i32
    scf.if %2 {
      %cst_18 = arith.constant -1.000000e+30 : f32
      %28 = vector.broadcast %cst_18 : f32 to vector<8x1xf32>
      %c0_19 = arith.constant 0 : index
      %c0_20 = arith.constant 0 : index
      %29 = vector.load %arg6[%c0_19, %c0_20] : memref<8x1xf32, #tpu.memory_space<vmem>>, vector<8x1xf32>
      tpu.vector_store %arg6[%c0_19, %c0_20], %28 {strides = array<i32>} : memref<8x1xf32, #tpu.memory_space<vmem>>, vector<8x1xf32>,
      %cst_21 = arith.constant 0.000000e+00 : f32
      %30 = vector.broadcast %cst_21 : f32 to vector<8x1xf32>
      %c0_22 = arith.constant 0 : index
      %c0_23 = arith.constant 0 : index
      %31 = vector.load %arg7[%c0_22, %c0_23] : memref<8x1xf32, #tpu.memory_space<vmem>>, vector<8x1xf32>
      tpu.vector_store %arg7[%c0_22, %c0_23], %30 {strides = array<i32>} : memref<8x1xf32, #tpu.memory_space<vmem>>, vector<8x1xf32>,
    } else {
    }
    %c0 = arith.constant 0 : index
    %c0_1 = arith.constant 0 : index
    %3 = vector.load %arg2[%c0, %c0_1] : memref<8x32xbf16, #tpu.memory_space<vmem>>, vector<8x32xbf16>
    %c0_2 = arith.constant 0 : index
    %c0_3 = arith.constant 0 : index
    %4 = vector.load %arg3[%c0_2, %c0_3] : memref<32x8xbf16, #tpu.memory_space<vmem>>, vector<32x8xbf16>
    %cst = arith.constant dense<0.000000e+00> : vector<8x8xf32>
    %5 = tpu.matmul %3, %4, %cst {dimension_numbers = #tpu.dot_dimension_numbers<[1], [0], [0], [1], [0, 0, 1, 1], [], []>} : vector<8x32xbf16>, vector<32x8xbf16>, vector<8x8xf32> -> vector<8x8xf32>
    %c0_4 = arith.constant 0 : index
    %c0_5 = arith.constant 0 : index
    %6 = vector.load %arg4[%c0_4, %c0_5] : memref<1x8xf32, #tpu.memory_space<vmem>>, vector<1x8xf32>
    %7 = vector.broadcast %6 : vector<1x8xf32> to vector<8x8xf32>
    %8 = arith.addf %5, %7 : vector<8x8xf32>
    %c0_6 = arith.constant 0 : index
    %c0_7 = arith.constant 0 : index
    %9 = vector.load %arg6[%c0_6, %c0_7] : memref<8x1xf32, #tpu.memory_space<vmem>>, vector<8x1xf32>
    %cst_8 = arith.constant dense<0xFF800000> : vector<8xf32>
    %10 = vector.multi_reduction <maximumf>, %8, %cst_8 [1] : vector<8x8xf32> to vector<8xf32>
    %11 = vector.shape_cast %10 : vector<8xf32> to vector<8x1xf32>
    %12 = arith.maximumf %9, %11 : vector<8x1xf32>
    %13 = arith.subf %9, %12 : vector<8x1xf32>
    %14 = math.exp %13 : vector<8x1xf32>
    %c0_9 = arith.constant 0 : index
    %c0_10 = arith.constant 0 : index
    %15 = vector.load %arg7[%c0_9, %c0_10] : memref<8x1xf32, #tpu.memory_space<vmem>>, vector<8x1xf32>
    %16 = arith.mulf %14, %15 : vector<8x1xf32>
    %17 = vector.broadcast %12 : vector<8x1xf32> to vector<8x8xf32>
    %18 = arith.subf %8, %17 : vector<8x8xf32>
    %19 = math.exp %18 : vector<8x8xf32>
    %cst_11 = arith.constant dense<0.000000e+00> : vector<8xf32>
    %20 = vector.multi_reduction <add>, %19, %cst_11 [1] : vector<8x8xf32> to vector<8xf32>
    %21 = vector.shape_cast %20 : vector<8xf32> to vector<8x1xf32>
    %22 = arith.addf %16, %21 : vector<8x1xf32>
    %c0_12 = arith.constant 0 : index
    %c0_13 = arith.constant 0 : index
    %23 = vector.load %arg7[%c0_12, %c0_13] : memref<8x1xf32, #tpu.memory_space<vmem>>, vector<8x1xf32>
    tpu.vector_store %arg7[%c0_12, %c0_13], %22 {strides = array<i32>} : memref<8x1xf32, #tpu.memory_space<vmem>>, vector<8x1xf32>,
    %c0_14 = arith.constant 0 : index
    %c0_15 = arith.constant 0 : index
    %24 = vector.load %arg6[%c0_14, %c0_15] : memref<8x1xf32, #tpu.memory_space<vmem>>, vector<8x1xf32>
    tpu.vector_store %arg6[%c0_14, %c0_15], %12 {strides = array<i32>} : memref<8x1xf32, #tpu.memory_space<vmem>>, vector<8x1xf32>,
    %c0_i32_16 = arith.constant 0 : i32
    %25 = arith.cmpi eq, %arg1, %c0_i32_16 : i32
    %26 = arith.extui %25 : i1 to i32
    %c0_i32_17 = arith.constant 0 : i32
    %27 = arith.cmpi ne, %26, %c0_i32_17 : i32
    scf.if %27 {
      %c0_18 = arith.constant 0 : index
      %c0_19 = arith.constant 0 : index
      %28 = vector.load %arg6[%c0_18, %c0_19] : memref<8x1xf32, #tpu.memory_space<vmem>>, vector<8x1xf32>
      %c0_20 = arith.constant 0 : index
      %c0_21 = arith.constant 0 : index
      %29 = vector.load %arg7[%c0_20, %c0_21] : memref<8x1xf32, #tpu.memory_space<vmem>>, vector<8x1xf32>
      %30 = math.log %29 : vector<8x1xf32>
      %31 = arith.addf %28, %30 : vector<8x1xf32>
      %c0_22 = arith.constant 0 : index
      %c0_23 = arith.constant 0 : index
      %32 = vector.load %arg5[%c0_22, %c0_23] : memref<8x1xf32, #tpu.memory_space<vmem>>, vector<8x1xf32>
      tpu.vector_store %arg5[%c0_22, %c0_23], %31 {strides = array<i32>} : memref<8x1xf32, #tpu.memory_space<vmem>>, vector<8x1xf32>,
    } else {
    }
    return
  }
  func.func @transform_0(%arg0: i32, %arg1: i32) -> (i32, i32) {
    %c0_i32 = arith.constant 0 : i32
    %c0_i32_0 = arith.constant 0 : i32
    return %arg0, %c0_i32 : i32, i32
  }
  func.func @transform_1(%arg0: i32, %arg1: i32) -> (i32, i32) {
    %c0_i32 = arith.constant 0 : i32
    %c0_i32_0 = arith.constant 0 : i32
    return %c0_i32, %arg1 : i32, i32
  }
  func.func @transform_2(%arg0: i32, %arg1: i32) -> (i32, i32) {
    %c0_i32 = arith.constant 0 : i32
    %c0_i32_0 = arith.constant 0 : i32
    return %c0_i32, %arg1 : i32, i32
  }
  func.func @transform_3(%arg0: i32, %arg1: i32) -> (i32, i32) {
    %c0_i32 = arith.constant 0 : i32
    %c0_i32_0 = arith.constant 0 : i32
    return %arg0, %c0_i32 : i32, i32
  }
}

</mosaic_0001>

<bundles_post_ra>
// kernel: cluster_kl_loss.1
= control target key start
LH: loop header
LB: loop body
LE: loop exit
PB: predicated region body
PF: predicated region fallthrough
CT: control target
= control target key end

     0   :  { %vm19_vm0 = vcmask 7168   ;;  %v157_v0 = vmov 0.0   ;;  %vm158_vm1 = vmmov 0   ;;  %vm46_vm2 = vcmask 261120   ;;  %s203_s1 = inlined_call_operand.vmem [shape: bf16[32,8], index: 1, kind: input, shape index: {}]   ;;  %s204_s0 = inlined_call_operand.vmem [shape: bf16[8,32], index: 0, kind: input, shape index: {}]   ;;  %s205_s2 = inlined_call_operand.vmem [shape: f32[1,8], index: 2, kind: input, shape index: {}]   ;;  %s206_s3 = inlined_call_operand.vmem [shape: f32[8,1], index: 3, kind: output, shape index: {}]  }
   0x1   :  { %21 = vst.msk [vmem:[#allocation3] sm:$0xff] %vm19_vm0, %v157_v0  ;;  %136 = vmatprep.subr.bf16.mxu0 %v157_v0  ;;  %v149_v1 = vld [vmem:[%s203_s1] sm:$0xff]   ;;  %140 = vmatprep.mubr.msk.bf16.mxu0 %vm158_vm1, %v157_v0  ;;  %v150_v2 = vld [vmem:[%s203_s1 + $0x8] sm:$0xff]   ;;  %v159_v4 = vmov -1e+30   ;;  %vm91_vm3 = vcmask 64512  }
   0x2   :  { %137 = vmatpush3.bf16.msra.mxu0 %v149_v1  ;;  %v22_v3 = vld [vmem:[%s204_s0] sm:$0xf]  ;;  %20 = vst.msk [vmem:[#allocation2] sm:$0xff] %vm19_vm0, %v159_v4  ;;  %v160_v12 = vmov 0  }
   0x3   :  { %138 = vmatprep.subr.bf16.mxu0 %v157_v0  ;;  %v129_v5 = vld [vmem:[%s205_s2] ss:$0 sm:$0xff]  ;;  %148 = vset.pattern.permute.xlu0 %v160_v12 }
   0x6   :  { %139 = vmatpush3.bf16.msra.mxu0 %v150_v2 }
   0x8   :  { %v99_v24 = vld [vmem:[#allocation3] sm:$0xff] }
   0x9   :  { %141 = vmatmul.mubr.msk.bf16.vlgmr.msra.gmra.mrb[0].mxu0 %vm46_vm2, %v22_v3  ;;  %v90_v13 = vld [vmem:[#allocation2] sm:$0xff] }
  0xdc   :  { %v84_v6 = vpop.f32.mrb[0].mxu0 }
  0xdd   :  { %v85_v7 = vadd.f32 %v129_v5, %v84_v6  ;;  %v142_v8 = vpop.f32.mrb[1].mxu0 }
  0xde   :  { %v87_v9 = vpop.f32.mrb[2].mxu0 }
  0xdf   :  { %v143_v10 = vpop.f32.mrb[3].mxu0  ;;  %v92_v11 = vsel %vm91_vm3, %v85_v7, -inf }
  0xe0   :  { %93 = vmax.xlane.f32.xlu0 %v92_v11 }
 0x16d   :  { %v94_v14 = vpop.xlane.xlu0 %93 }
 0x16e   :  { %v95_v15 = vmax.f32 %v90_v13, %v94_v14 }
 0x170   :  { %v96_v16 = vsub.f32 %v90_v13, %v95_v15  ;;  %115 = vst.msk [vmem:[#allocation2] sm:$0xff] %vm19_vm0, %v95_v15  ;;  %103 = vperm.xlu0 %148, %v95_v15  }
 0x172   :  { %v97_v22 = vmul.f32 1.442695, %v96_v16 }
 0x177   :  { %v119_v31 = vld [vmem:[#allocation2] sm:$0xff] }
 0x1ef   :  { %v104_v17 = vpop.permute.xlu0 %103 }
 0x1f0   :  { %v106_v18 = vsub.f32 %v85_v7, %v104_v17 }
 0x1f2   :  { %v107_v19 = vmul.f32 1.442695, %v106_v18 }
 0x1f4   :  { %151 = vpow2.f32 %v107_v19 }
 0x1f5   :  { %153 = vpow2.f32 %v97_v22 }
 0x1fe   :  { %v152_v20 = vpop.eup %151 }
 0x1ff   :  { %v109_v21 = vsel %vm91_vm3, %v152_v20, 0.0  ;;  %v154_v23 = vpop.eup %153 }
 0x200   :  { %110 = vadd.xlane.f32.xlu1 %v109_v21  ;;  %v100_v25 = vmul.f32 %v154_v23, %v99_v24 }
 0x28d   :  { %v111_v26 = vpop.xlane.xlu1 %110 }
 0x28e   :  { %v112_v27 = vadd.f32 %v111_v26, %v100_v25 }
 0x290   :  { %114 = vst.msk [vmem:[#allocation3] sm:$0xff] %vm19_vm0, %v112_v27 }
 0x297   :  { %v120_v28 = vld [vmem:[#allocation3] sm:$0xff] }
 0x298   :  { %155 = vlog2.f32 %v120_v28 }
 0x2a2   :  { %v156_v29 = vpop.eup %155 }
 0x2a3   :  { %v122_v30 = vmul.f32 0.6931472, %v156_v29 }
 0x2a5   :  { %v123_v32 = vadd.f32 %v122_v30, %v119_v31 }
 0x2a7   :  { %124 = vst.msk [vmem:[%s206_s3] sm:$0xff] %vm19_vm0, %v123_v32 }

</bundles_post_ra>
